<compile_context>
chip_gen: v5e
topology: v5e:2x2
jax: 0.10.0
libtpu: 0.0.40
codegen_flags: <defaults>
</compile_context>

<pallas_src>
import functools

import jax
import jax.numpy as jnp
from jax.experimental import pallas as pl
from jax.experimental.pallas import tpu as pltpu


def _round_up(x, m):
    return (x + m - 1) // m * m


def _vmem_capacity_bytes():
    """Physical per-core VMEM; conservative fallback if the query is unavailable."""
    try:
        return int(pltpu.get_tpu_info().vmem_capacity_bytes)
    except Exception:
        return 64 * 1024 * 1024  # v7x per-TensorCore VMEM (smallest current part)


# ----------------------------------------------------------------------------
# Pallas kernel: fused conv(3x3, pad 1) + ReLU + global-avg-pool + linear
# ----------------------------------------------------------------------------
def _encoder_kernel(x_ref, k_ref, w2_ref, b2_ref, o_ref, *, inv_hw):
    # x_ref : (H, TB, KDIM)   bf16  per output row y: padded input rows [y, y+1, y+2]
    #                               flattened, a constant-1 bias lane, zero lanes to KDIM.
    # k_ref : (KDIM, W*HID)   bf16  conv weight unrolled over (di, dj, output column),
    #                               conv bias placed on the constant-1 lane's row.
    # w2_ref: (W*HID, OUT_P)  bf16  projection weight tiled over output columns
    #                               (global pooling over W folded into this matmul).
    # b2_ref: (1, OUT_P)      f32
    # o_ref : (TB, OUT_P)     bf16
    h_out, tb, _ = x_ref.shape
    whid = k_ref.shape[-1]

    kmat = k_ref[...]
    acc = jnp.zeros((tb, whid), jnp.float32)
    # Static unroll over the H output rows: the only live f32 intermediate is one
    # (TB, W*HID) row, consumed immediately into the accumulator.
    for y in range(h_out):
        hrow = jnp.dot(x_ref[y], kmat, preferred_element_type=jnp.float32)
        acc = acc + jnp.maximum(hrow, 0.0)

    # Mean pool: 1/HW applied in f32 here; the sum over the W columns happens in
    # the final matmul because w2 is tiled over output columns.
    pooled = (acc * inv_hw).astype(jnp.bfloat16)
    out = jnp.dot(pooled, w2_ref[...], preferred_element_type=jnp.float32)
    out = out + b2_ref[...]
    o_ref[...] = out.astype(o_ref.dtype)


@functools.partial(jax.jit, static_argnames=("output_size",))
def image_encoder_wrapper(inputs, params, output_size):
    """Equivalent of ImageEncoderWrapper.forward for the concrete CNN encoder.

    inputs: (..., C, H, W)  arbitrary leading dims (PyTorch NCHW trailing dims)
    returns: (..., output_size) float32
    """
    w1, b1, w2, b2 = params          # (9C,HID), (1,HID), (HID,OUT), (1,OUT) — all f32
    lead_shape = inputs.shape[:-3]
    c, h, w = inputs.shape[-3:]
    hp, wp = h + 2, w + 2
    hid = w1.shape[-1]
    whid = w * hid
    hw = h * w

    # --- inputs.view(-1, C, H, W) -------------------------------------------
    x = inputs.reshape((-1, c, h, w))
    bsz = x.shape[0]

    # --- batch tiling / VMEM budget (generation-aware) -----------------------
    vmem_cap = _vmem_capacity_bytes()
    tb_cap = 512 if vmem_cap >= 96 * 1024 * 1024 else 256   # v5e/v6e vs v7x
    tb = min(tb_cap, _round_up(bsz, 16))
    if bsz >= 32 and bsz <= tb:
        # Keep >= 2 grid steps so v7x's two TensorCores both get work; the extra
        # ~0.35 us grid step is negligible on single-core v5e/v6e.
        tb = _round_up((bsz + 1) // 2, 16)
    bsz_p = _round_up(bsz, tb)
    grid = (bsz_p // tb,)
    vmem_limit = min(vmem_cap // 2, 64 * 1024 * 1024)

    # --- activations: NCHW -> padded NHWC rows, pre-windowed per output row ---
    # x3[y, b, :] = [xpad[b, y], xpad[b, y+1], xpad[b, y+2]] flattened (3*Wp*C),
    # then a constant-1 lane (conv bias) and zero lanes up to KDIM (mult of 128).
    kdim = _round_up(3 * wp * c + 1, 128)
    x_nhwc = jnp.transpose(x, (0, 2, 3, 1)).astype(jnp.bfloat16)        # (B,H,W,C)
    x_pad = jnp.pad(x_nhwc, ((0, 0), (1, 1), (1, 1), (0, 0)))           # (B,Hp,Wp,C)
    x_rows = x_pad.reshape(bsz, hp, wp * c)                             # (B,Hp,Wp*C)
    wins = [x_rows[:, y:y + 3, :].reshape(1, bsz, 3 * wp * c) for y in range(h)]
    x3 = jnp.concatenate(wins, axis=0)                                  # (H,B,3*Wp*C)
    ones = jnp.ones((h, bsz, 1), jnp.bfloat16)                          # bias lane
    x3 = jnp.concatenate([x3, ones], axis=-1)
    x3 = jnp.pad(x3, ((0, 0), (0, bsz_p - bsz), (0, kdim - x3.shape[-1])))

    # --- conv weight unrolled over (di, dj, output column) --------------------
    # kmat[di*Wp*C + (xcol+dj)*C + cc, xcol*HID + f] = w1[(di*3+dj)*C + cc, f]
    w1_di = w1.reshape(3, 3 * c, hid)                                   # (di, dj*C+cc, f)
    cols = []
    for xcol in range(w):
        top = xcol * c
        bot = wp * c - top - 3 * c
        cols.append(jnp.pad(w1_di, ((0, 0), (top, bot), (0, 0))))       # (3, Wp*C, HID)
    kmat = jnp.concatenate(cols, axis=-1).reshape(3 * wp * c, whid)     # (3*Wp*C, W*HID)
    bias_row = jnp.tile(b1.astype(jnp.float32), (1, w))                 # (1, W*HID)
    kmat = jnp.concatenate([kmat, bias_row], axis=0)                    # bias lane row
    kmat = jnp.pad(kmat, ((0, kdim - kmat.shape[0]), (0, 0))).astype(jnp.bfloat16)

    # --- projection with global average pooling (over W) folded in ------------
    out_p = _round_up(output_size, 128)
    w2t = jnp.tile(w2, (w, 1))                                          # (W*HID, OUT)
    w2t = jnp.pad(w2t, ((0, 0), (0, out_p - output_size))).astype(jnp.bfloat16)
    b2_p = jnp.pad(b2.astype(jnp.float32), ((0, 0), (0, out_p - output_size)))

    kernel = functools.partial(_encoder_kernel, inv_hw=1.0 / float(hw))

    out_flat = pl.pallas_call(
        kernel,
        out_shape=jax.ShapeDtypeStruct((bsz_p, out_p), jnp.bfloat16),
        grid_spec=pltpu.PrefetchScalarGridSpec(
            num_scalar_prefetch=0,
            grid=grid,
            in_specs=[
                pl.BlockSpec((h, tb, kdim), lambda i: (0, i, 0)),
                # Constant index maps -> weights stay VMEM-resident across steps.
                pl.BlockSpec((kdim, whid), lambda i: (0, 0)),
                pl.BlockSpec((whid, out_p), lambda i: (0, 0)),
                pl.BlockSpec((1, out_p), lambda i: (0, 0)),
            ],
            out_specs=pl.BlockSpec((tb, out_p), lambda i: (i, 0)),
        ),
        compiler_params=pltpu.CompilerParams(
            dimension_semantics=("parallel",),
            vmem_limit_bytes=vmem_limit,
        ),
    )(x3, kmat, w2t, b2_p)

    # Drop batch / lane padding, upcast to f32 on the real outputs only, then
    # encoded_batch.view(*inputs.size()[:-3], output_size).
    out = out_flat[:bsz, :output_size].astype(jnp.float32)
    return out.reshape(*lead_shape, output_size)


# ----------------------------------------------------------------------------
# Pure-JAX reference + parameter init
# ----------------------------------------------------------------------------
def _im2col_nhwc(x_nhwc, k=3, pad=1):
    """(N, H, W, C) -> (N, H*W, k*k*C) with zero padding (stride 1)."""
    n, h, w, c = x_nhwc.shape
    xp = jnp.pad(x_nhwc, ((0, 0), (pad, pad), (pad, pad), (0, 0)))
    cols = []
    for di in range(k):
        for dj in range(k):
            cols.append(xp[:, di:di + h, dj:dj + w, :])
    return jnp.concatenate(cols, axis=-1).reshape(n, h * w, k * k * c)


def _reference(inputs, params, output_size):
    """Pure-JAX reference mirroring the kernel's bf16-in / f32-accum precision."""
    w1, b1, w2, b2 = params
    lead_shape = inputs.shape[:-3]
    c, h, w = inputs.shape[-3:]
    x = inputs.reshape((-1, c, h, w))
    x_nhwc = jnp.transpose(x, (0, 2, 3, 1))
    patches = _im2col_nhwc(x_nhwc, k=3, pad=1)
    hcv = jnp.einsum("bpk,kh->bph",
                     patches.astype(jnp.bfloat16), w1.astype(jnp.bfloat16),
                     preferred_element_type=jnp.float32) + b1
    hcv = jnp.maximum(hcv, 0.0)
    pooled = jnp.mean(hcv, axis=1)
    out = jnp.dot(pooled.astype(jnp.bfloat16), w2.astype(jnp.bfloat16),
                  preferred_element_type=jnp.float32) + b2[0]
    return out.reshape(*lead_shape, output_size)


def _init_params(key, c_in, hidden, output_size, k=3):
    k1, k2, k3, k4 = jax.random.split(key, 4)
    fan1 = k * k * c_in
    w1 = jax.random.normal(k1, (fan1, hidden), jnp.float32) * (2.0 / fan1) ** 0.5
    b1 = jax.random.normal(k2, (1, hidden), jnp.float32) * 0.01
    w2 = jax.random.normal(k3, (hidden, output_size), jnp.float32) * (1.0 / hidden) ** 0.5
    b2 = jax.random.normal(k4, (1, output_size), jnp.float32) * 0.01
    return (w1, b1, w2, b2)


if __name__ == "__main__":
    key = jax.random.PRNGKey(0)
    kx, kp = jax.random.split(key)

    # Extra leading dims exercise the wrapper's view(-1, C, H, W) semantics.
    C, H, W = 4, 8, 8
    HIDDEN = 32
    OUTPUT_SIZE = 16
    x = jax.random.normal(kx, (2, 3, C, H, W), jnp.float32)   # (..., C, H, W)

    params = _init_params(kp, C, HIDDEN, OUTPUT_SIZE)

    out = image_encoder_wrapper(x, params, OUTPUT_SIZE)
    out = jax.block_until_ready(out)
    assert out.shape == (2, 3, OUTPUT_SIZE), out.shape

    ref = _reference(x, params, OUTPUT_SIZE)
    max_err = float(jnp.max(jnp.abs(out - ref)))
    assert jnp.allclose(out, ref, atol=2e-2, rtol=2e-2), max_err

    print("KERNEL_OK")
</pallas_src>

<mosaic_0001>
module attributes {stable_mosaic.version = 11 : i64} {
  func.func @_encoder_kernel(%arg0: i32, %arg1: memref<8x16x128xbf16, #tpu.memory_space<vmem>>, %arg2: memref<128x256xbf16, #tpu.memory_space<vmem>>, %arg3: memref<256x128xbf16, #tpu.memory_space<vmem>>, %arg4: memref<1x128xf32, #tpu.memory_space<vmem>>, %arg5: memref<16x128xbf16, #tpu.memory_space<vmem>>) attributes {dimension_semantics = [#tpu.dimension_semantics<parallel>], iteration_bounds = array<i64: 1>, scalar_prefetch = 0 : i64, scratch_operands = 0 : i64, tpu.core_type = #tpu.core_type<tc>, window_params = [{transform_indices = @transform_0, window_bounds = array<i64: 8, 16, 128>}, {pipeline_mode = #tpu.pipeline_mode<synchronous>, transform_indices = @transform_1, window_bounds = array<i64: 128, 256>}, {pipeline_mode = #tpu.pipeline_mode<synchronous>, transform_indices = @transform_2, window_bounds = array<i64: 256, 128>}, {pipeline_mode = #tpu.pipeline_mode<synchronous>, transform_indices = @transform_3, window_bounds = array<i64: 1, 128>}, {transform_indices = @transform_4, window_bounds = array<i64: 16, 128>}]} {
    %c0 = arith.constant 0 : index
    %c0_0 = arith.constant 0 : index
    %0 = vector.load %arg2[%c0, %c0_0] : memref<128x256xbf16, #tpu.memory_space<vmem>>, vector<128x256xbf16>
    %cst = arith.constant 0.000000e+00 : f32
    %1 = vector.broadcast %cst : f32 to vector<16x256xf32>
    %c0_1 = arith.constant 0 : index
    %c0_2 = arith.constant 0 : index
    %c0_3 = arith.constant 0 : index
    %2 = vector.load %arg1[%c0_1, %c0_2, %c0_3] : memref<8x16x128xbf16, #tpu.memory_space<vmem>>, vector<1x16x128xbf16>
    %3 = vector.shape_cast %2 : vector<1x16x128xbf16> to vector<16x128xbf16>
    %cst_4 = arith.constant dense<0.000000e+00> : vector<16x256xf32>
    %4 = tpu.matmul %3, %0, %cst_4 {dimension_numbers = #tpu.dot_dimension_numbers<[1], [0], [0], [1], [0, 0, 1, 1], [], []>} : vector<16x128xbf16>, vector<128x256xbf16>, vector<16x256xf32> -> vector<16x256xf32>
    %cst_5 = arith.constant 0.000000e+00 : f32
    %5 = vector.broadcast %cst_5 : f32 to vector<16x256xf32>
    %6 = arith.maximumf %4, %5 : vector<16x256xf32>
    %7 = arith.addf %1, %6 : vector<16x256xf32>
    %c1 = arith.constant 1 : index
    %c0_6 = arith.constant 0 : index
    %c0_7 = arith.constant 0 : index
    %8 = vector.load %arg1[%c1, %c0_6, %c0_7] : memref<8x16x128xbf16, #tpu.memory_space<vmem>>, vector<1x16x128xbf16>
    %9 = vector.shape_cast %8 : vector<1x16x128xbf16> to vector<16x128xbf16>
    %cst_8 = arith.constant dense<0.000000e+00> : vector<16x256xf32>
    %10 = tpu.matmul %9, %0, %cst_8 {dimension_numbers = #tpu.dot_dimension_numbers<[1], [0], [0], [1], [0, 0, 1, 1], [], []>} : vector<16x128xbf16>, vector<128x256xbf16>, vector<16x256xf32> -> vector<16x256xf32>
    %cst_9 = arith.constant 0.000000e+00 : f32
    %11 = vector.broadcast %cst_9 : f32 to vector<16x256xf32>
    %12 = arith.maximumf %10, %11 : vector<16x256xf32>
    %13 = arith.addf %7, %12 : vector<16x256xf32>
    %c2 = arith.constant 2 : index
    %c0_10 = arith.constant 0 : index
    %c0_11 = arith.constant 0 : index
    %14 = vector.load %arg1[%c2, %c0_10, %c0_11] : memref<8x16x128xbf16, #tpu.memory_space<vmem>>, vector<1x16x128xbf16>
    %15 = vector.shape_cast %14 : vector<1x16x128xbf16> to vector<16x128xbf16>
    %cst_12 = arith.constant dense<0.000000e+00> : vector<16x256xf32>
    %16 = tpu.matmul %15, %0, %cst_12 {dimension_numbers = #tpu.dot_dimension_numbers<[1], [0], [0], [1], [0, 0, 1, 1], [], []>} : vector<16x128xbf16>, vector<128x256xbf16>, vector<16x256xf32> -> vector<16x256xf32>
    %cst_13 = arith.constant 0.000000e+00 : f32
    %17 = vector.broadcast %cst_13 : f32 to vector<16x256xf32>
    %18 = arith.maximumf %16, %17 : vector<16x256xf32>
    %19 = arith.addf %13, %18 : vector<16x256xf32>
    %c3 = arith.constant 3 : index
    %c0_14 = arith.constant 0 : index
    %c0_15 = arith.constant 0 : index
    %20 = vector.load %arg1[%c3, %c0_14, %c0_15] : memref<8x16x128xbf16, #tpu.memory_space<vmem>>, vector<1x16x128xbf16>
    %21 = vector.shape_cast %20 : vector<1x16x128xbf16> to vector<16x128xbf16>
    %cst_16 = arith.constant dense<0.000000e+00> : vector<16x256xf32>
    %22 = tpu.matmul %21, %0, %cst_16 {dimension_numbers = #tpu.dot_dimension_numbers<[1], [0], [0], [1], [0, 0, 1, 1], [], []>} : vector<16x128xbf16>, vector<128x256xbf16>, vector<16x256xf32> -> vector<16x256xf32>
    %cst_17 = arith.constant 0.000000e+00 : f32
    %23 = vector.broadcast %cst_17 : f32 to vector<16x256xf32>
    %24 = arith.maximumf %22, %23 : vector<16x256xf32>
    %25 = arith.addf %19, %24 : vector<16x256xf32>
    %c4 = arith.constant 4 : index
    %c0_18 = arith.constant 0 : index
    %c0_19 = arith.constant 0 : index
    %26 = vector.load %arg1[%c4, %c0_18, %c0_19] : memref<8x16x128xbf16, #tpu.memory_space<vmem>>, vector<1x16x128xbf16>
    %27 = vector.shape_cast %26 : vector<1x16x128xbf16> to vector<16x128xbf16>
    %cst_20 = arith.constant dense<0.000000e+00> : vector<16x256xf32>
    %28 = tpu.matmul %27, %0, %cst_20 {dimension_numbers = #tpu.dot_dimension_numbers<[1], [0], [0], [1], [0, 0, 1, 1], [], []>} : vector<16x128xbf16>, vector<128x256xbf16>, vector<16x256xf32> -> vector<16x256xf32>
    %cst_21 = arith.constant 0.000000e+00 : f32
    %29 = vector.broadcast %cst_21 : f32 to vector<16x256xf32>
    %30 = arith.maximumf %28, %29 : vector<16x256xf32>
    %31 = arith.addf %25, %30 : vector<16x256xf32>
    %c5 = arith.constant 5 : index
    %c0_22 = arith.constant 0 : index
    %c0_23 = arith.constant 0 : index
    %32 = vector.load %arg1[%c5, %c0_22, %c0_23] : memref<8x16x128xbf16, #tpu.memory_space<vmem>>, vector<1x16x128xbf16>
    %33 = vector.shape_cast %32 : vector<1x16x128xbf16> to vector<16x128xbf16>
    %cst_24 = arith.constant dense<0.000000e+00> : vector<16x256xf32>
    %34 = tpu.matmul %33, %0, %cst_24 {dimension_numbers = #tpu.dot_dimension_numbers<[1], [0], [0], [1], [0, 0, 1, 1], [], []>} : vector<16x128xbf16>, vector<128x256xbf16>, vector<16x256xf32> -> vector<16x256xf32>
    %cst_25 = arith.constant 0.000000e+00 : f32
    %35 = vector.broadcast %cst_25 : f32 to vector<16x256xf32>
    %36 = arith.maximumf %34, %35 : vector<16x256xf32>
    %37 = arith.addf %31, %36 : vector<16x256xf32>
    %c6 = arith.constant 6 : index
    %c0_26 = arith.constant 0 : index
    %c0_27 = arith.constant 0 : index
    %38 = vector.load %arg1[%c6, %c0_26, %c0_27] : memref<8x16x128xbf16, #tpu.memory_space<vmem>>, vector<1x16x128xbf16>
    %39 = vector.shape_cast %38 : vector<1x16x128xbf16> to vector<16x128xbf16>
    %cst_28 = arith.constant dense<0.000000e+00> : vector<16x256xf32>
    %40 = tpu.matmul %39, %0, %cst_28 {dimension_numbers = #tpu.dot_dimension_numbers<[1], [0], [0], [1], [0, 0, 1, 1], [], []>} : vector<16x128xbf16>, vector<128x256xbf16>, vector<16x256xf32> -> vector<16x256xf32>
    %cst_29 = arith.constant 0.000000e+00 : f32
    %41 = vector.broadcast %cst_29 : f32 to vector<16x256xf32>
    %42 = arith.maximumf %40, %41 : vector<16x256xf32>
    %43 = arith.addf %37, %42 : vector<16x256xf32>
    %c7 = arith.constant 7 : index
    %c0_30 = arith.constant 0 : index
    %c0_31 = arith.constant 0 : index
    %44 = vector.load %arg1[%c7, %c0_30, %c0_31] : memref<8x16x128xbf16, #tpu.memory_space<vmem>>, vector<1x16x128xbf16>
    %45 = vector.shape_cast %44 : vector<1x16x128xbf16> to vector<16x128xbf16>
    %cst_32 = arith.constant dense<0.000000e+00> : vector<16x256xf32>
    %46 = tpu.matmul %45, %0, %cst_32 {dimension_numbers = #tpu.dot_dimension_numbers<[1], [0], [0], [1], [0, 0, 1, 1], [], []>} : vector<16x128xbf16>, vector<128x256xbf16>, vector<16x256xf32> -> vector<16x256xf32>
    %cst_33 = arith.constant 0.000000e+00 : f32
    %47 = vector.broadcast %cst_33 : f32 to vector<16x256xf32>
    %48 = arith.maximumf %46, %47 : vector<16x256xf32>
    %49 = arith.addf %43, %48 : vector<16x256xf32>
    %cst_34 = arith.constant 1.562500e-02 : f32
    %50 = vector.broadcast %cst_34 : f32 to vector<16x256xf32>
    %51 = arith.mulf %49, %50 : vector<16x256xf32>
    %52 = arith.truncf %51 : vector<16x256xf32> to vector<16x256xbf16>
    %c0_35 = arith.constant 0 : index
    %c0_36 = arith.constant 0 : index
    %53 = vector.load %arg3[%c0_35, %c0_36] : memref<256x128xbf16, #tpu.memory_space<vmem>>, vector<256x128xbf16>
    %cst_37 = arith.constant dense<0.000000e+00> : vector<16x128xf32>
    %54 = tpu.matmul %52, %53, %cst_37 {dimension_numbers = #tpu.dot_dimension_numbers<[1], [0], [0], [1], [0, 0, 1, 1], [], []>} : vector<16x256xbf16>, vector<256x128xbf16>, vector<16x128xf32> -> vector<16x128xf32>
    %c0_38 = arith.constant 0 : index
    %c0_39 = arith.constant 0 : index
    %55 = vector.load %arg4[%c0_38, %c0_39] : memref<1x128xf32, #tpu.memory_space<vmem>>, vector<1x128xf32>
    %56 = vector.broadcast %55 : vector<1x128xf32> to vector<16x128xf32>
    %57 = arith.addf %54, %56 : vector<16x128xf32>
    %58 = arith.truncf %57 : vector<16x128xf32> to vector<16x128xbf16>
    %c0_40 = arith.constant 0 : index
    %c0_41 = arith.constant 0 : index
    %59 = vector.load %arg5[%c0_40, %c0_41] : memref<16x128xbf16, #tpu.memory_space<vmem>>, vector<16x128xbf16>
    tpu.vector_store %arg5[%c0_40, %c0_41], %58 {strides = array<i32>} : memref<16x128xbf16, #tpu.memory_space<vmem>>, vector<16x128xbf16>,
    return
  }
  func.func @transform_0(%arg0: i32) -> (i32, i32, i32) {
    %c0_i32 = arith.constant 0 : i32
    %c0_i32_0 = arith.constant 0 : i32
    %c0_i32_1 = arith.constant 0 : i32
    return %c0_i32, %arg0, %c0_i32_0 : i32, i32, i32
  }
  func.func @transform_1(%arg0: i32) -> (i32, i32) {
    %c0_i32 = arith.constant 0 : i32
    %c0_i32_0 = arith.constant 0 : i32
    %c0_i32_1 = arith.constant 0 : i32
    return %c0_i32, %c0_i32_0 : i32, i32
  }
  func.func @transform_2(%arg0: i32) -> (i32, i32) {
    %c0_i32 = arith.constant 0 : i32
    %c0_i32_0 = arith.constant 0 : i32
    %c0_i32_1 = arith.constant 0 : i32
    return %c0_i32, %c0_i32_0 : i32, i32
  }
  func.func @transform_3(%arg0: i32) -> (i32, i32) {
    %c0_i32 = arith.constant 0 : i32
    %c0_i32_0 = arith.constant 0 : i32
    %c0_i32_1 = arith.constant 0 : i32
    return %c0_i32, %c0_i32_0 : i32, i32
  }
  func.func @transform_4(%arg0: i32) -> (i32, i32) {
    %c0_i32 = arith.constant 0 : i32
    %c0_i32_0 = arith.constant 0 : i32
    return %arg0, %c0_i32 : i32, i32
  }
}

</mosaic_0001>

<bundles_post_ra>
// kernel: image_encoder_wrapper.1
= control target key start
LH: loop header
LB: loop body
LE: loop exit
PB: predicated region body
PF: predicated region fallthrough
CT: control target
= control target key end

     0   :  { %s1243_s1 = inlined_call_operand.vmem [shape: bf16[128,256], index: 1, kind: input, shape index: {}]   ;;  %s1244_s0 = inlined_call_operand.vmem [shape: bf16[8,16,128], index: 0, kind: input, shape index: {}]   ;;  %s1245_s3 = inlined_call_operand.vmem [shape: f32[1,128], index: 3, kind: input, shape index: {}]   ;;  %s1246_s2 = inlined_call_operand.vmem [shape: bf16[256,128], index: 2, kind: input, shape index: {}]   ;;  %s1247_s4 = inlined_call_operand.vmem [shape: bf16[16,128], index: 4, kind: output, shape index: {}]  }
   0x1   :  { %v708_v0 = vld [vmem:[%s1243_s1 + $0x70] sm:$0xf]  ;;  %v835_v1 = vld [vmem:[%s1243_s1 + $0x74] sm:$0xf0]  ;;  %v834_v2 = vld [vmem:[%s1243_s1 + $0x74] sm:$0xf] }
   0x2   :  { %v900_v3 = vor.u32 %v835_v1, %v708_v0  ;;  %v710_v4 = vld [vmem:[%s1243_s1 + $0x78] sm:$0xf0]  ;;  %v700_v5 = vld [vmem:[%s1243_s1 + $0x60] sm:$0xf]  ;;  %v833_v6 = vld [vmem:[%s1243_s1 + $0x64] sm:$0xf0] }
   0x3   :  { %v911_v7 = vor.u32 %v834_v2, %v710_v4  ;;  %v832_v8 = vld [vmem:[%s1243_s1 + $0x64] sm:$0xf]  ;;  %v702_v9 = vld [vmem:[%s1243_s1 + $0x68] sm:$0xf0]  ;;  %v921_v10 = vor.u32 %v833_v6, %v700_v5  ;;  %v692_v12 = vld [vmem:[%s1243_s1 + $0x50] sm:$0xf] }
   0x4   :  { %121 = vmatpush.bf16.msra.mxu0 %v900_v3  ;;  %166 = vmatpush.bf16.msra.mxu2 %v900_v3  ;;  %v925_v11 = vor.u32 %v832_v8, %v702_v9  ;;  %v831_v13 = vld [vmem:[%s1243_s1 + $0x54] sm:$0xf0]  ;;  %v830_v14 = vld [vmem:[%s1243_s1 + $0x54] sm:$0xf]  ;;  %v694_v15 = vld [vmem:[%s1243_s1 + $0x58] sm:$0xf0] }
   0x5   :  { %135 = vmatpush.bf16.msra.mxu1 %v911_v7  ;;  %180 = vmatpush.bf16.msra.mxu3 %v911_v7  ;;  %v941_v16 = vor.u32 %v831_v13, %v692_v12  ;;  %v945_v17 = vor.u32 %v830_v14, %v694_v15  ;;  %v684_v18 = vld [vmem:[%s1243_s1 + $0x40] sm:$0xf]  ;;  %v829_v19 = vld [vmem:[%s1243_s1 + $0x44] sm:$0xf0]  ;;  %v828_v20 = vld [vmem:[%s1243_s1 + $0x44] sm:$0xf] }
   0x6   :  { %v686_v21 = vld [vmem:[%s1243_s1 + $0x48] sm:$0xf0]  ;;  %v961_v22 = vor.u32 %v829_v19, %v684_v18  ;;  %v676_v24 = vld [vmem:[%s1243_s1 + $0x30] sm:$0xf]  ;;  %v827_v25 = vld [vmem:[%s1243_s1 + $0x34] sm:$0xf0] }
   0x7   :  { %v965_v23 = vor.u32 %v828_v20, %v686_v21  ;;  %v826_v26 = vld [vmem:[%s1243_s1 + $0x34] sm:$0xf]  ;;  %v678_v27 = vld [vmem:[%s1243_s1 + $0x38] sm:$0xf0]  ;;  %v981_v28 = vor.u32 %v827_v25, %v676_v24  ;;  %v668_v30 = vld [vmem:[%s1243_s1 + $0x20] sm:$0xf] }
   0x8   :  { %122 = vmatpush.bf16.msra.mxu0 %v921_v10  ;;  %167 = vmatpush.bf16.msra.mxu2 %v921_v10  ;;  %v985_v29 = vor.u32 %v826_v26, %v678_v27  ;;  %v825_v31 = vld [vmem:[%s1243_s1 + $0x24] sm:$0xf0]  ;;  %v824_v32 = vld [vmem:[%s1243_s1 + $0x24] sm:$0xf]  ;;  %v670_v33 = vld [vmem:[%s1243_s1 + $0x28] sm:$0xf0] }
   0x9   :  { %136 = vmatpush.bf16.msra.mxu1 %v925_v11  ;;  %181 = vmatpush.bf16.msra.mxu3 %v925_v11  ;;  %v1001_v34 = vor.u32 %v825_v31, %v668_v30  ;;  %v1005_v35 = vor.u32 %v824_v32, %v670_v33  ;;  %v660_v36 = vld [vmem:[%s1243_s1 + $0x10] sm:$0xf]  ;;  %v823_v37 = vld [vmem:[%s1243_s1 + $0x14] sm:$0xf0]  ;;  %v822_v38 = vld [vmem:[%s1243_s1 + $0x14] sm:$0xf] }
   0xa   :  { %v662_v39 = vld [vmem:[%s1243_s1 + $0x18] sm:$0xf0]  ;;  %v1021_v40 = vor.u32 %v823_v37, %v660_v36  ;;  %v652_v42 = vld [vmem:[%s1243_s1] sm:$0xf]  ;;  %v821_v43 = vld [vmem:[%s1243_s1 + $0x4] sm:$0xf0] }
   0xb   :  { %v1025_v41 = vor.u32 %v822_v38, %v662_v39  ;;  %v820_v44 = vld [vmem:[%s1243_s1 + $0x4] sm:$0xf]  ;;  %v654_v45 = vld [vmem:[%s1243_s1 + $0x8] sm:$0xf0]  ;;  %v1041_v46 = vor.u32 %v821_v43, %v652_v42  ;;  %v838_v50 = vld [vmem:[%s1244_s0 + $0x10] sm:$0xff] }
   0xc   :  { %123 = vmatpush.bf16.msra.mxu0 %v941_v16  ;;  %168 = vmatpush.bf16.msra.mxu2 %v941_v16  ;;  %v1045_v47 = vor.u32 %v820_v44, %v654_v45  ;;  %v836_v48 = vld [vmem:[%s1244_s0] sm:$0xff]  ;;  %v837_v49 = vld [vmem:[%s1244_s0 + $0x8] sm:$0xff]  ;;  %v839_v51 = vld [vmem:[%s1244_s0 + $0x18] sm:$0xff] }
   0xd   :  { %137 = vmatpush.bf16.msra.mxu1 %v945_v17  ;;  %182 = vmatpush.bf16.msra.mxu3 %v945_v17  ;;  %v840_v52 = vld [vmem:[%s1244_s0 + $0x20] sm:$0xff]  ;;  %v841_v53 = vld [vmem:[%s1244_s0 + $0x28] sm:$0xff]  ;;  %v842_v54 = vld [vmem:[%s1244_s0 + $0x30] sm:$0xff] }
   0xe   :  { %v843_v55 = vld [vmem:[%s1244_s0 + $0x38] sm:$0xff]  ;;  %v850_v0 = vld [vmem:[%s1246_s2 + $0x30] sm:$0xff]  ;;  %v849_v6 = vld [vmem:[%s1246_s2 + $0x28] sm:$0xff] }
   0xf   :  { %v851_v62 = vld [vmem:[%s1246_s2 + $0x38] sm:$0xff]  ;;  %v858_v1 = vld [vmem:[%s1246_s2 + $0x70] sm:$0xff]  ;;  %v844_v24 = vld [vmem:[%s1246_s2] sm:$0xff] }
  0x10   :  { %124 = vmatpush.bf16.msra.mxu0 %v961_v22  ;;  %169 = vmatpush.bf16.msra.mxu2 %v961_v22  ;;  %v859_v63 = vld [vmem:[%s1246_s2 + $0x78] sm:$0xff]  ;;  %v852_v25 = vld [vmem:[%s1246_s2 + $0x40] sm:$0xff] }
  0x11   :  { %138 = vmatpush.bf16.msra.mxu1 %v965_v23  ;;  %183 = vmatpush.bf16.msra.mxu3 %v965_v23  ;;  %v847_v14 = vld [vmem:[%s1246_s2 + $0x18] sm:$0xff] }
  0x12   :  { %v855_v15 = vld [vmem:[%s1246_s2 + $0x58] sm:$0xff] }
  0x14   :  { %125 = vmatpush.bf16.msra.mxu0 %v981_v28  ;;  %170 = vmatpush.bf16.msra.mxu2 %v981_v28 }
  0x15   :  { %139 = vmatpush.bf16.msra.mxu1 %v985_v29  ;;  %184 = vmatpush.bf16.msra.mxu3 %v985_v29 }
  0x18   :  { %126 = vmatpush.bf16.msra.mxu0 %v1001_v34  ;;  %171 = vmatpush.bf16.msra.mxu2 %v1001_v34 }
  0x19   :  { %140 = vmatpush.bf16.msra.mxu1 %v1005_v35  ;;  %185 = vmatpush.bf16.msra.mxu3 %v1005_v35 }
  0x1c   :  { %127 = vmatpush.bf16.msra.mxu0 %v1021_v40  ;;  %172 = vmatpush.bf16.msra.mxu2 %v1021_v40 }
  0x1d   :  { %141 = vmatpush.bf16.msra.mxu1 %v1025_v41  ;;  %186 = vmatpush.bf16.msra.mxu3 %v1025_v41 }
  0x20   :  { %128 = vmatpush.bf16.msra.mxu0 %v1041_v46  ;;  %173 = vmatpush.bf16.msra.mxu2 %v1041_v46 }
  0x21   :  { %142 = vmatpush.bf16.msra.mxu1 %v1045_v47  ;;  %187 = vmatpush.bf16.msra.mxu3 %v1045_v47 }
  0x23   :  { %129 = vmatmul.bf16.vlgmr.msra.gmra.mxu0 %v836_v48  ;;  %174 = vmatmul.bf16.vlgmr.msra.gmra.mxu2 %v837_v49 }
  0x24   :  { %211 = vmatpush.bf16.msrb.mxu0 %v900_v3  ;;  %256 = vmatpush.bf16.msrb.mxu2 %v900_v3 }
  0x25   :  { %225 = vmatpush.bf16.msrb.mxu1 %v911_v7  ;;  %270 = vmatpush.bf16.msrb.mxu3 %v911_v7 }
  0x26   :  { %143 = vmatmul.bf16.vlgmr.msra.gmra.mxu1 %v836_v48  ;;  %188 = vmatmul.bf16.vlgmr.msra.gmra.mxu3 %v837_v49 }
  0x28   :  { %212 = vmatpush.bf16.msrb.mxu0 %v921_v10  ;;  %257 = vmatpush.bf16.msrb.mxu2 %v921_v10 }
  0x29   :  { %226 = vmatpush.bf16.msrb.mxu1 %v925_v11  ;;  %271 = vmatpush.bf16.msrb.mxu3 %v925_v11 }
  0x2c   :  { %213 = vmatpush.bf16.msrb.mxu0 %v941_v16  ;;  %258 = vmatpush.bf16.msrb.mxu2 %v941_v16 }
  0x2d   :  { %227 = vmatpush.bf16.msrb.mxu1 %v945_v17  ;;  %272 = vmatpush.bf16.msrb.mxu3 %v945_v17 }
  0x30   :  { %214 = vmatpush.bf16.msrb.mxu0 %v961_v22  ;;  %259 = vmatpush.bf16.msrb.mxu2 %v961_v22 }
  0x31   :  { %228 = vmatpush.bf16.msrb.mxu1 %v965_v23  ;;  %273 = vmatpush.bf16.msrb.mxu3 %v965_v23 }
  0x34   :  { %215 = vmatpush.bf16.msrb.mxu0 %v981_v28  ;;  %260 = vmatpush.bf16.msrb.mxu2 %v981_v28 }
  0x35   :  { %229 = vmatpush.bf16.msrb.mxu1 %v985_v29  ;;  %274 = vmatpush.bf16.msrb.mxu3 %v985_v29 }
  0x38   :  { %216 = vmatpush.bf16.msrb.mxu0 %v1001_v34  ;;  %261 = vmatpush.bf16.msrb.mxu2 %v1001_v34 }
  0x39   :  { %230 = vmatpush.bf16.msrb.mxu1 %v1005_v35  ;;  %275 = vmatpush.bf16.msrb.mxu3 %v1005_v35 }
  0x3c   :  { %217 = vmatpush.bf16.msrb.mxu0 %v1021_v40  ;;  %262 = vmatpush.bf16.msrb.mxu2 %v1021_v40 }
  0x3d   :  { %231 = vmatpush.bf16.msrb.mxu1 %v1025_v41  ;;  %276 = vmatpush.bf16.msrb.mxu3 %v1025_v41 }
  0x40   :  { %218 = vmatpush.bf16.msrb.mxu0 %v1041_v46  ;;  %263 = vmatpush.bf16.msrb.mxu2 %v1041_v46 }
  0x41   :  { %232 = vmatpush.bf16.msrb.mxu1 %v1045_v47  ;;  %277 = vmatpush.bf16.msrb.mxu3 %v1045_v47 }
  0x43   :  { %219 = vmatmul.bf16.vlgmr.msrb.gmra.mxu0 %v838_v50  ;;  %264 = vmatmul.bf16.vlgmr.msrb.gmra.mxu2 %v839_v51 }
  0x44   :  { %301 = vmatpush.bf16.msra.mxu0 %v900_v3  ;;  %346 = vmatpush.bf16.msra.mxu2 %v900_v3 }
  0x45   :  { %315 = vmatpush.bf16.msra.mxu1 %v911_v7  ;;  %360 = vmatpush.bf16.msra.mxu3 %v911_v7 }
  0x46   :  { %233 = vmatmul.bf16.vlgmr.msrb.gmra.mxu1 %v838_v50  ;;  %278 = vmatmul.bf16.vlgmr.msrb.gmra.mxu3 %v839_v51 }
  0x48   :  { %302 = vmatpush.bf16.msra.mxu0 %v921_v10  ;;  %347 = vmatpush.bf16.msra.mxu2 %v921_v10 }
  0x49   :  { %316 = vmatpush.bf16.msra.mxu1 %v925_v11  ;;  %361 = vmatpush.bf16.msra.mxu3 %v925_v11 }
  0x4c   :  { %303 = vmatpush.bf16.msra.mxu0 %v941_v16  ;;  %348 = vmatpush.bf16.msra.mxu2 %v941_v16 }
  0x4d   :  { %317 = vmatpush.bf16.msra.mxu1 %v945_v17  ;;  %362 = vmatpush.bf16.msra.mxu3 %v945_v17 }
  0x50   :  { %304 = vmatpush.bf16.msra.mxu0 %v961_v22  ;;  %349 = vmatpush.bf16.msra.mxu2 %v961_v22 }
  0x51   :  { %318 = vmatpush.bf16.msra.mxu1 %v965_v23  ;;  %363 = vmatpush.bf16.msra.mxu3 %v965_v23 }
  0x54   :  { %305 = vmatpush.bf16.msra.mxu0 %v981_v28  ;;  %350 = vmatpush.bf16.msra.mxu2 %v981_v28 }
  0x55   :  { %319 = vmatpush.bf16.msra.mxu1 %v985_v29  ;;  %364 = vmatpush.bf16.msra.mxu3 %v985_v29 }
  0x58   :  { %306 = vmatpush.bf16.msra.mxu0 %v1001_v34  ;;  %351 = vmatpush.bf16.msra.mxu2 %v1001_v34 }
  0x59   :  { %320 = vmatpush.bf16.msra.mxu1 %v1005_v35  ;;  %365 = vmatpush.bf16.msra.mxu3 %v1005_v35 }
  0x5c   :  { %307 = vmatpush.bf16.msra.mxu0 %v1021_v40  ;;  %352 = vmatpush.bf16.msra.mxu2 %v1021_v40 }
  0x5d   :  { %321 = vmatpush.bf16.msra.mxu1 %v1025_v41  ;;  %366 = vmatpush.bf16.msra.mxu3 %v1025_v41 }
  0x60   :  { %308 = vmatpush.bf16.msra.mxu0 %v1041_v46  ;;  %353 = vmatpush.bf16.msra.mxu2 %v1041_v46 }
  0x61   :  { %322 = vmatpush.bf16.msra.mxu1 %v1045_v47  ;;  %367 = vmatpush.bf16.msra.mxu3 %v1045_v47 }
  0x63   :  { %309 = vmatmul.bf16.vlgmr.msra.gmra.mxu0 %v840_v52  ;;  %354 = vmatmul.bf16.vlgmr.msra.gmra.mxu2 %v841_v53 }
  0x64   :  { %391 = vmatpush.bf16.msrb.mxu0 %v900_v3  ;;  %436 = vmatpush.bf16.msrb.mxu2 %v900_v3 }
  0x65   :  { %405 = vmatpush.bf16.msrb.mxu1 %v911_v7  ;;  %450 = vmatpush.bf16.msrb.mxu3 %v911_v7  ;;  %v857_v7 = vld [vmem:[%s1246_s2 + $0x68] sm:$0xff] }
  0x66   :  { %323 = vmatmul.bf16.vlgmr.msra.gmra.mxu1 %v840_v52  ;;  %368 = vmatmul.bf16.vlgmr.msra.gmra.mxu3 %v841_v53 }
  0x68   :  { %392 = vmatpush.bf16.msrb.mxu0 %v921_v10  ;;  %437 = vmatpush.bf16.msrb.mxu2 %v921_v10  ;;  %v848_v10 = vld [vmem:[%s1246_s2 + $0x20] sm:$0xff] }
  0x69   :  { %406 = vmatpush.bf16.msrb.mxu1 %v925_v11  ;;  %451 = vmatpush.bf16.msrb.mxu3 %v925_v11  ;;  %v856_v11 = vld [vmem:[%s1246_s2 + $0x60] sm:$0xff] }
  0x6c   :  { %393 = vmatpush.bf16.msrb.mxu0 %v941_v16  ;;  %438 = vmatpush.bf16.msrb.mxu2 %v941_v16  ;;  %v846_v16 = vld [vmem:[%s1246_s2 + $0x10] sm:$0xff] }
  0x6d   :  { %407 = vmatpush.bf16.msrb.mxu1 %v945_v17  ;;  %452 = vmatpush.bf16.msrb.mxu3 %v945_v17  ;;  %v854_v17 = vld [vmem:[%s1246_s2 + $0x50] sm:$0xff] }
  0x70   :  { %394 = vmatpush.bf16.msrb.mxu0 %v961_v22  ;;  %439 = vmatpush.bf16.msrb.mxu2 %v961_v22  ;;  %v845_v22 = vld [vmem:[%s1246_s2 + $0x8] sm:$0xff] }
  0x71   :  { %408 = vmatpush.bf16.msrb.mxu1 %v965_v23  ;;  %453 = vmatpush.bf16.msrb.mxu3 %v965_v23  ;;  %v853_v23 = vld [vmem:[%s1246_s2 + $0x48] sm:$0xff] }
  0x74   :  { %395 = vmatpush.bf16.msrb.mxu0 %v981_v28  ;;  %440 = vmatpush.bf16.msrb.mxu2 %v981_v28 }
  0x75   :  { %409 = vmatpush.bf16.msrb.mxu1 %v985_v29  ;;  %454 = vmatpush.bf16.msrb.mxu3 %v985_v29 }
  0x78   :  { %396 = vmatpush.bf16.msrb.mxu0 %v1001_v34  ;;  %441 = vmatpush.bf16.msrb.mxu2 %v1001_v34 }
  0x79   :  { %410 = vmatpush.bf16.msrb.mxu1 %v1005_v35  ;;  %455 = vmatpush.bf16.msrb.mxu3 %v1005_v35 }
  0x7c   :  { %397 = vmatpush.bf16.msrb.mxu0 %v1021_v40  ;;  %442 = vmatpush.bf16.msrb.mxu2 %v1021_v40 }
  0x7d   :  { %411 = vmatpush.bf16.msrb.mxu1 %v1025_v41  ;;  %456 = vmatpush.bf16.msrb.mxu3 %v1025_v41 }
  0x80   :  { %398 = vmatpush.bf16.msrb.mxu0 %v1041_v46  ;;  %443 = vmatpush.bf16.msrb.mxu2 %v1041_v46 }
  0x81   :  { %412 = vmatpush.bf16.msrb.mxu1 %v1045_v47  ;;  %457 = vmatpush.bf16.msrb.mxu3 %v1045_v47 }
  0x83   :  { %399 = vmatmul.bf16.vlgmr.msrb.gmra.mxu0 %v842_v54  ;;  %444 = vmatmul.bf16.vlgmr.msrb.gmra.mxu2 %v843_v55 }
  0x84   :  { %413 = vmatmul.bf16.vlgmr.msrb.gmra.mxu1 %v842_v54  ;;  %458 = vmatmul.bf16.vlgmr.msrb.gmra.mxu3 %v843_v55 }
  0x85   :  { %610 = vmatpush.bf16.msra.mxu0 %v851_v62  ;;  %624 = vmatpush.bf16.msra.mxu1 %v859_v63 }
  0x89   :  { %611 = vmatpush.bf16.msra.mxu0 %v850_v0  ;;  %625 = vmatpush.bf16.msra.mxu1 %v858_v1 }
  0x8d   :  { %612 = vmatpush.bf16.msra.mxu0 %v849_v6  ;;  %626 = vmatpush.bf16.msra.mxu1 %v857_v7 }
  0x91   :  { %613 = vmatpush.bf16.msra.mxu0 %v848_v10  ;;  %627 = vmatpush.bf16.msra.mxu1 %v856_v11 }
  0x95   :  { %614 = vmatpush.bf16.msra.mxu0 %v847_v14  ;;  %628 = vmatpush.bf16.msra.mxu1 %v855_v15 }
  0x99   :  { %615 = vmatpush.bf16.msra.mxu0 %v846_v16  ;;  %629 = vmatpush.bf16.msra.mxu1 %v854_v17 }
  0x9d   :  { %616 = vmatpush.bf16.msra.mxu0 %v845_v22  ;;  %630 = vmatpush.bf16.msra.mxu1 %v853_v23 }
  0xa0   :  { %v130_v56 = vpop.f32.mrf.mxu0 }
  0xa1   :  { %617 = vmatpush.bf16.msra.mxu0 %v844_v24  ;;  %631 = vmatpush.bf16.msra.mxu1 %v852_v25  ;;  %v149_v30 = vmax.f32 %v130_v56, 0.0 }
  0xa3   :  { %v144_v57 = vpop.f32.mrf.mxu1 }
  0xa4   :  { %v150_v31 = vmax.f32 %v144_v57, 0.0 }
  0xa6   :  { %v175_v58 = vpop.f32.mrf.mxu2 }
  0xa7   :  { %v194_v32 = vmax.f32 %v175_v58, 0.0 }
  0xa8   :  { %v1171_v60 = vpop.f32.mrf.mxu0 }
  0xa9   :  { %v189_v59 = vpop.f32.mrf.mxu3  ;;  %v198_v34 = vadd.f32 %v194_v32, %v149_v30  ;;  %v151_v42 = vmax.f32 %v1171_v60, 0.0 }
  0xaa   :  { %v195_v33 = vmax.f32 %v189_v59, 0.0 }
  0xab   :  { %v1173_v61 = vpop.f32.mrf.mxu1 }
  0xac   :  { %v199_v35 = vadd.f32 %v195_v33, %v150_v31  ;;  %v152_v43 = vmax.f32 %v1173_v61, 0.0 }
  0xae   :  { %v1187_v2 = vpop.f32.mrf.mxu2 }
  0xaf   :  { %v196_v44 = vmax.f32 %v1187_v2, 0.0 }
  0xb1   :  { %v1189_v3 = vpop.f32.mrf.mxu3  ;;  %v200_v54 = vadd.f32 %v196_v44, %v151_v42  ;;  %v865_v44 = vld [vmem:[%s1245_s3] ss:$0 sm:$0xff] }
  0xb2   :  { %v197_v45 = vmax.f32 %v1189_v3, 0.0 }
  0xb4   :  { %v201_v55 = vadd.f32 %v197_v45, %v152_v43 }
  0xc0   :  { %v220_v4 = vpop.f32.mrf.mxu0 }
  0xc1   :  { %v239_v36 = vmax.f32 %v220_v4, 0.0 }
  0xc3   :  { %v234_v5 = vpop.f32.mrf.mxu1  ;;  %v243_v46 = vadd.f32 %v239_v36, %v198_v34 }
  0xc4   :  { %v240_v37 = vmax.f32 %v234_v5, 0.0 }
  0xc6   :  { %v265_v8 = vpop.f32.mrf.mxu2  ;;  %v244_v47 = vadd.f32 %v240_v37, %v199_v35 }
  0xc7   :  { %v284_v48 = vmax.f32 %v265_v8, 0.0 }
  0xc8   :  { %v222_v12 = vpop.f32.mrf.mxu0 }
  0xc9   :  { %v279_v9 = vpop.f32.mrf.mxu3  ;;  %v241_v50 = vmax.f32 %v222_v12, 0.0  ;;  %v288_v58 = vadd.f32 %v284_v48, %v243_v46 }
  0xca   :  { %v285_v49 = vmax.f32 %v279_v9, 0.0 }
  0xcb   :  { %v236_v13 = vpop.f32.mrf.mxu1  ;;  %v245_v0 = vadd.f32 %v241_v50, %v200_v54 }
  0xcc   :  { %v242_v51 = vmax.f32 %v236_v13, 0.0  ;;  %v289_v59 = vadd.f32 %v285_v49, %v244_v47 }
  0xce   :  { %v1215_v18 = vpop.f32.mrf.mxu2  ;;  %v246_v1 = vadd.f32 %v242_v51, %v201_v55 }
  0xcf   :  { %v286_v56 = vmax.f32 %v1215_v18, 0.0 }
  0xd1   :  { %v1217_v19 = vpop.f32.mrf.mxu3  ;;  %v290_v10 = vadd.f32 %v286_v56, %v245_v0 }
  0xd2   :  { %v287_v57 = vmax.f32 %v1217_v19, 0.0 }
  0xd4   :  { %v291_v11 = vadd.f32 %v287_v57, %v246_v1 }
  0xe0   :  { %v310_v20 = vpop.f32.mrf.mxu0 }
  0xe1   :  { %v329_v52 = vmax.f32 %v310_v20, 0.0 }
  0xe3   :  { %v324_v21 = vpop.f32.mrf.mxu1  ;;  %v333_v4 = vadd.f32 %v329_v52, %v288_v58 }
  0xe4   :  { %v330_v53 = vmax.f32 %v324_v21, 0.0 }
  0xe6   :  { %v355_v26 = vpop.f32.mrf.mxu2  ;;  %v334_v5 = vadd.f32 %v330_v53, %v289_v59 }
  0xe7   :  { %v374_v60 = vmax.f32 %v355_v26, 0.0 }
  0xe8   :  { %v312_v28 = vpop.f32.mrf.mxu0 }
  0xe9   :  { %v369_v27 = vpop.f32.mrf.mxu3  ;;  %v331_v2 = vmax.f32 %v312_v28, 0.0  ;;  %v378_v14 = vadd.f32 %v374_v60, %v333_v4 }
  0xea   :  { %v375_v61 = vmax.f32 %v369_v27, 0.0 }
  0xeb   :  { %v326_v29 = vpop.f32.mrf.mxu1  ;;  %v335_v18 = vadd.f32 %v331_v2, %v290_v10 }
  0xec   :  { %v332_v3 = vmax.f32 %v326_v29, 0.0  ;;  %v379_v15 = vadd.f32 %v375_v61, %v334_v5 }
  0xee   :  { %v357_v38 = vpop.f32.mrf.mxu2  ;;  %v336_v19 = vadd.f32 %v332_v3, %v291_v11 }
  0xef   :  { %v376_v12 = vmax.f32 %v357_v38, 0.0 }
  0xf1   :  { %v371_v39 = vpop.f32.mrf.mxu3  ;;  %v380_v24 = vadd.f32 %v376_v12, %v335_v18 }
  0xf2   :  { %v377_v13 = vmax.f32 %v371_v39, 0.0 }
  0xf4   :  { %v381_v25 = vadd.f32 %v377_v13, %v336_v19 }
 0x100   :  { %v400_v40 = vpop.f32.mrf.mxu0 }
 0x101   :  { %v414_v41 = vpop.f32.mrf.mxu1  ;;  %v419_v6 = vmax.f32 %v400_v40, 0.0 }
 0x102   :  { %v420_v7 = vmax.f32 %v414_v41, 0.0 }
 0x103   :  { %v423_v22 = vadd.f32 %v419_v6, %v378_v14 }
 0x104   :  { %v424_v23 = vadd.f32 %v420_v7, %v379_v15 }
 0x106   :  { %v445_v62 = vpop.f32.mrf.mxu2 }
 0x107   :  { %v459_v63 = vpop.f32.mrf.mxu3  ;;  %v464_v16 = vmax.f32 %v445_v62, 0.0 }
 0x108   :  { %v402_v8 = vpop.f32.mrf.mxu0  ;;  %v465_v17 = vmax.f32 %v459_v63, 0.0 }
 0x109   :  { %v416_v9 = vpop.f32.mrf.mxu1  ;;  %v421_v20 = vmax.f32 %v402_v8, 0.0  ;;  %v468_v26 = vadd.f32 %v464_v16, %v423_v22 }
 0x10a   :  { %v422_v21 = vmax.f32 %v416_v9, 0.0  ;;  %v469_v27 = vadd.f32 %v465_v17, %v424_v23 }
 0x10b   :  { %v425_v30 = vadd.f32 %v421_v20, %v380_v24  ;;  %v472_v36 = vmul.f32 0.015625, %v468_v26 }
 0x10c   :  { %v426_v31 = vadd.f32 %v422_v21, %v381_v25  ;;  %v473_v37 = vmul.f32 0.015625, %v469_v27 }
 0x10e   :  { %v447_v28 = vpop.f32.mrf.mxu2 }
 0x10f   :  { %v461_v29 = vpop.f32.mrf.mxu3  ;;  %v466_v32 = vmax.f32 %v447_v28, 0.0 }
 0x110   :  { %v467_v33 = vmax.f32 %v461_v29, 0.0 }
 0x111   :  { %v470_v34 = vadd.f32 %v466_v32, %v425_v30 }
 0x112   :  { %v471_v35 = vadd.f32 %v467_v33, %v426_v31 }
 0x113   :  { %v474_v38 = vmul.f32 0.015625, %v470_v34 }
 0x114   :  { %v475_v39 = vmul.f32 0.015625, %v471_v35 }
 0x115   :  { %v476_v40 = vpack.c.bf16 %v474_v38, %v472_v36 }
 0x116   :  { %v477_v41 = vpack.c.bf16 %v475_v39, %v473_v37 }
 0x117   :  { %618 = vmatmul.bf16.vlgmr.msra.gmra.mxu0 %v476_v40 }
 0x118   :  { %632 = vmatmul.bf16.vlgmr.msra.gmra.mxu1 %v477_v41 }
 0x194   :  { %v619_v42 = vpop.f32.mrf.mxu0 }
 0x195   :  { %v633_v43 = vpop.f32.mrf.mxu1  ;;  %v620_v45 = vadd.f32 %v865_v44, %v619_v42 }
 0x197   :  { %v634_v49 = vadd.f32 %v633_v43, %v620_v45 }
 0x19c   :  { %v621_v46 = vpop.f32.mrf.mxu0 }
 0x19d   :  { %v622_v47 = vadd.f32 %v865_v44, %v621_v46  ;;  %v635_v48 = vpop.f32.mrf.mxu1 }
 0x19f   :  { %v636_v50 = vadd.f32 %v635_v48, %v622_v47 }
 0x1a1   :  { %v863_v51 = vpack.c.bf16 %v636_v50, %v634_v49 }
 0x1a3   :  { %864 = vst [vmem:[%s1247_s4] sm:$0xff] %v863_v51  }

</bundles_post_ra>
